<compile_context>
chip_gen: v7x
topology: tpu7x:2x2x1
jax: 0.10.0
libtpu: 0.0.40
codegen_flags: <defaults>
</compile_context>

<pallas_src>
import functools
import math

import jax
import jax.numpy as jnp
from jax.experimental import pallas as pl
from jax.experimental.pallas import tpu as pltpu


def _round_up(x, m):
    return ((x + m - 1) // m) * m


def _vmem_capacity_bytes():
    try:
        return int(pltpu.get_tpu_info().vmem_capacity_bytes)
    except Exception:
        return 64 << 20  # conservative default (v7x per-core VMEM)


def _vmem_limit_bytes():
    return int(min(_vmem_capacity_bytes() * 3 // 4, 100 << 20))


def _weight_tile_bytes(dim_p, tile_h):
    # fused up/gate tile (dim_p, 2*tile_h) + down tile (tile_h, dim_p),
    # bf16, double-buffered.
    return 2 * (dim_p * 2 * tile_h + tile_h * dim_p) * 2


def _choose_tile_h(dim_p, hdim_128, vmem_limit):
    """Pick the hdim tile width. Prefer fully VMEM-resident weights."""
    w_budget = int(vmem_limit * 0.4)
    if _weight_tile_bytes(dim_p, hdim_128) <= w_budget:
        return hdim_128                       # weights DMA'd once, resident
    tile_h = min(hdim_128, 512)               # stream; spend VMEM on tile_n
    while _weight_tile_bytes(dim_p, tile_h) > w_budget and tile_h > 128:
        tile_h //= 2
    return tile_h


def _pick_tile_n(n_8, dim_p, tile_h, vmem_limit, tile_n=None):
    """Row tile: grow first (raises flop/byte of weight streaming)."""
    if tile_n is not None:
        return tile_n
    budget = int(vmem_limit * 0.85)
    w_bytes = _weight_tile_bytes(dim_p, tile_h)

    def usage(tn):
        return (2 * tn * dim_p * 2        # x bf16, double-buffered
                + 2 * tn * dim_p * 4      # f32 output (doubles as accumulator)
                + w_bytes                 # weight tiles
                + 4 * tn * tile_h * 4)    # u/v/hidden f32 temporaries + slack

    tile_n = min(512, n_8)
    while tile_n * 2 <= min(n_8, 1024) and usage(tile_n * 2) <= budget:
        tile_n *= 2
    while usage(tile_n) > budget and tile_n > 8:
        tile_n = max(8, _round_up(tile_n // 2, 8))
    # Megacore load balance: prefer >= 2 row tiles when there is enough work.
    if tile_n >= n_8 and n_8 >= 256:
        tile_n = _round_up((n_8 + 1) // 2, 8)
    return tile_n


def prepack_params(params, *, tile_h=None):
    """One-time weight prepack: transpose, fold scales, fuse, pad, cast bf16."""
    hdim, dim = params["Wup"].shape
    dim_p = _round_up(dim, 128)
    hdim_128 = _round_up(hdim, 128)
    vmem_limit = _vmem_limit_bytes()
    if tile_h is None:
        tile_h = _choose_tile_h(dim_p, hdim_128, vmem_limit)
    hdim_p = _round_up(hdim_128, tile_h)
    n_h = hdim_p // tile_h

    # Scale.forward() == s * (init / scale); fold sqrt(dim) into the gate path.
    su = (params["s_u"] * (params["s_u_init"] / params["s_u_scale"])).astype(jnp.float32)
    sv = (params["s_v"] * (params["s_v_init"] / params["s_v_scale"])).astype(jnp.float32)
    sv = sv * math.sqrt(dim)

    # PyTorch Linear computes x @ W.T -> transpose to [in, out]; fold scales
    # into the columns IN F32, then pad and cast to bf16.
    wup = params["Wup"].astype(jnp.float32).T * su[None, :]
    wgate = params["Wgate"].astype(jnp.float32).T * sv[None, :]
    wup = jnp.pad(wup, ((0, dim_p - dim), (0, hdim_p - hdim)))
    wgate = jnp.pad(wgate, ((0, dim_p - dim), (0, hdim_p - hdim)))
    # Interleave per hdim tile so block h = [Wup tile h | Wgate tile h].
    wug = jnp.concatenate(
        [wup.reshape(dim_p, n_h, tile_h), wgate.reshape(dim_p, n_h, tile_h)],
        axis=2).reshape(dim_p, 2 * hdim_p).astype(jnp.bfloat16)

    wdown = jnp.pad(params["Wdown"].astype(jnp.float32).T,
                    ((0, hdim_p - hdim), (0, dim_p - dim))).astype(jnp.bfloat16)

    return {"wug": wug, "wdown": wdown,
            "dim": dim, "hdim": hdim, "dim_p": dim_p, "hdim_p": hdim_p,
            "tile_h": tile_h, "vmem_limit": vmem_limit}


def _mlp_kernel(x_ref, wug_ref, wdown_ref, o_ref):
    """One (row-tile, hdim-tile) step: fused up/gate matmul, silu, down-proj."""
    h = pl.program_id(1)
    th = wdown_ref.shape[0]

    x = x_ref[...]                                                    # (TN, Dp) bf16
    uv = jnp.dot(x, wug_ref[...], preferred_element_type=jnp.float32)  # (TN, 2*TH) f32
    u = uv[:, :th]                         # scales already folded into weights
    v = uv[:, th:]
    v = v * jax.nn.sigmoid(v)              # silu, in place
    hidden = (u * v).astype(wdown_ref.dtype)
    down = jnp.dot(hidden, wdown_ref[...], preferred_element_type=jnp.float32)

    # Accumulate directly into the resident f32 output block (constant along h).
    @pl.when(h == 0)
    def _():
        o_ref[...] = down

    @pl.when(h != 0)
    def _():
        o_ref[...] += down


def mlp_forward(x, params, *, tile_n=None, tile_h=None):
    """x: [batch, seq, dim].  params: raw param dict or prepack_params() output."""
    if "wug" not in params:
        params = prepack_params(params, tile_h=tile_h)
    p = params

    batch, seq, dim = x.shape
    assert dim == p["dim"], "x feature dim does not match prepacked weights"
    dim_p, hdim_p, th = p["dim_p"], p["hdim_p"], p["tile_h"]
    n = batch * seq
    n_8 = _round_up(n, 8)

    tile_n = _pick_tile_n(n_8, dim_p, th, p["vmem_limit"], tile_n)
    n_p = _round_up(n, tile_n)

    x2d = jnp.pad(x.reshape(n, dim).astype(jnp.bfloat16),
                  ((0, n_p - n), (0, dim_p - dim)))

    grid = (n_p // tile_n, hdim_p // th)       # hdim (reduction) axis last

    out2d = pl.pallas_call(
        _mlp_kernel,
        out_shape=jax.ShapeDtypeStruct((n_p, dim_p), jnp.float32),
        grid=grid,
        in_specs=[
            pl.BlockSpec((tile_n, dim_p), lambda i, h: (i, 0)),   # x: once per row tile
            pl.BlockSpec((dim_p, 2 * th), lambda i, h: (0, h)),   # fused [Wup|Wgate] tile
            pl.BlockSpec((th, dim_p), lambda i, h: (h, 0)),       # Wdown rows
        ],
        out_specs=pl.BlockSpec((tile_n, dim_p), lambda i, h: (i, 0)),
        compiler_params=pltpu.CompilerParams(
            dimension_semantics=("parallel", "arbitrary"),
            vmem_limit_bytes=p["vmem_limit"]),
    )(x2d, p["wug"], p["wdown"])

    return out2d[:n, :dim].reshape(batch, seq, dim).astype(x.dtype)


def init_params(key, dim, mlp_ratio=4):
    hdim = int(mlp_ratio * dim)
    k1, k2, k3, k4, k5 = jax.random.split(key, 5)
    bound_in = 1.0 / math.sqrt(dim)
    bound_h = 1.0 / math.sqrt(hdim)
    scale_u, scale_v = 0.5, 2.0
    return {
        "Wup": jax.random.uniform(k1, (hdim, dim), jnp.float32, -bound_in, bound_in),
        "Wgate": jax.random.uniform(k2, (hdim, dim), jnp.float32, -bound_in, bound_in),
        "Wdown": jax.random.uniform(k3, (dim, hdim), jnp.float32, -bound_h, bound_h),
        # Scale(hdim): s initialised to ones*scale; perturbed so the
        # s * (init / scale) path is actually exercised.
        "s_u": jnp.ones((hdim,), jnp.float32) * scale_u
               + 0.05 * jax.random.normal(k4, (hdim,), jnp.float32),
        "s_u_scale": scale_u,
        "s_u_init": 1.0,
        "s_v": jnp.ones((hdim,), jnp.float32) * scale_v
               + 0.05 * jax.random.normal(k5, (hdim,), jnp.float32),
        "s_v_scale": scale_v,
        "s_v_init": 1.0,
    }


def mlp_reference(x, params):
    """Pure-JAX f32 reference mirroring the PyTorch forward."""
    dim = x.shape[-1]
    u = x @ params["Wup"].T
    v = x @ params["Wgate"].T
    su = params["s_u"] * (params["s_u_init"] / params["s_u_scale"])
    sv = params["s_v"] * (params["s_v_init"] / params["s_v_scale"])
    u = u * su
    v = v * sv * math.sqrt(dim)
    hidden = u * (v * jax.nn.sigmoid(v))
    return hidden @ params["Wdown"].T


if __name__ == "__main__":
    key = jax.random.PRNGKey(0)
    kx, kp = jax.random.split(key)

    # Small demo shapes consistent with the module: dim=32, mlp_ratio=4 -> hdim=128.
    batch, seq, dim = 2, 8, 32
    x = jax.random.normal(kx, (batch, seq, dim), jnp.float32)
    params = init_params(kp, dim, mlp_ratio=4)

    out = jax.block_until_ready(mlp_forward(x, params))
    ref = mlp_reference(x, params)
    assert out.shape == (batch, seq, dim)
    rel = float(jnp.max(jnp.abs(out - ref)) / (jnp.max(jnp.abs(ref)) + 1e-6))
    assert rel < 5e-2, f"mismatch vs reference (rel err {rel})"

    # Larger shape forcing a real (rows x hdim) grid plus row/dim/hdim padding,
    # with explicit tiles to exercise multi-step hdim accumulation.
    kx2, kp2 = jax.random.split(jax.random.PRNGKey(1))
    b2, s2, d2 = 4, 100, 192                 # N=400; hdim=768
    x2 = jax.random.normal(kx2, (b2, s2, d2), jnp.float32)
    params2 = init_params(kp2, d2, mlp_ratio=4)
    out2 = jax.block_until_ready(mlp_forward(x2, params2, tile_n=128, tile_h=256))
    ref2 = mlp_reference(x2, params2)
    rel2 = float(jnp.max(jnp.abs(out2 - ref2)) / (jnp.max(jnp.abs(ref2)) + 1e-6))
    assert rel2 < 5e-2, f"mismatch vs reference on tiled shape (rel err {rel2})"

    # Same shape with auto tiles + one-time prepack (resident weights,
    # megacore row-tile guard path).
    packed2 = prepack_params(params2)
    out3 = jax.block_until_ready(mlp_forward(x2, packed2))
    rel3 = float(jnp.max(jnp.abs(out3 - ref2)) / (jnp.max(jnp.abs(ref2)) + 1e-6))
    assert rel3 < 5e-2, f"mismatch vs reference on prepacked path (rel err {rel3})"

    print("KERNEL_OK")
</pallas_src>

<mosaic_0001>
module attributes {stable_mosaic.version = 11 : i64} {
  func.func @_mlp_kernel(%arg0: i32, %arg1: i32, %arg2: memref<16x128xbf16, #tpu.memory_space<vmem>>, %arg3: memref<128x256xbf16, #tpu.memory_space<vmem>>, %arg4: memref<128x128xbf16, #tpu.memory_space<vmem>>, %arg5: memref<16x128xf32, #tpu.memory_space<vmem>>) attributes {dimension_semantics = [#tpu.dimension_semantics<parallel>, #tpu.dimension_semantics<arbitrary>], iteration_bounds = array<i64: 1, 1>, scalar_prefetch = 0 : i64, scratch_operands = 0 : i64, tpu.core_type = #tpu.core_type<tc>, window_params = [{transform_indices = @transform_0, window_bounds = array<i64: 16, 128>}, {transform_indices = @transform_1, window_bounds = array<i64: 128, 256>}, {transform_indices = @transform_2, window_bounds = array<i64: 128, 128>}, {transform_indices = @transform_3, window_bounds = array<i64: 16, 128>}]} {
    %c0 = arith.constant 0 : index
    %c0_0 = arith.constant 0 : index
    %0 = vector.load %arg2[%c0, %c0_0] : memref<16x128xbf16, #tpu.memory_space<vmem>>, vector<16x128xbf16>
    %c0_1 = arith.constant 0 : index
    %c0_2 = arith.constant 0 : index
    %1 = vector.load %arg3[%c0_1, %c0_2] : memref<128x256xbf16, #tpu.memory_space<vmem>>, vector<128x256xbf16>
    %cst = arith.constant dense<0.000000e+00> : vector<16x256xf32>
    %2 = tpu.matmul %0, %1, %cst {dimension_numbers = #tpu.dot_dimension_numbers<[1], [0], [0], [1], [0, 0, 1, 1], [], []>} : vector<16x128xbf16>, vector<128x256xbf16>, vector<16x256xf32> -> vector<16x256xf32>
    %3 = vector.extract_strided_slice %2 {offsets = [0, 0], sizes = [16, 128], strides = [1, 1]} : vector<16x256xf32> to vector<16x128xf32>
    %4 = vector.extract_strided_slice %2 {offsets = [0, 128], sizes = [16, 128], strides = [1, 1]} : vector<16x256xf32> to vector<16x128xf32>
    %5 = arith.negf %4 : vector<16x128xf32>
    %6 = math.exp %5 : vector<16x128xf32>
    %cst_3 = arith.constant 1.000000e+00 : f32
    %7 = vector.broadcast %cst_3 : f32 to vector<16x128xf32>
    %8 = arith.addf %7, %6 : vector<16x128xf32>
    %9 = arith.divf %7, %8 : vector<16x128xf32>
    %10 = arith.mulf %4, %9 : vector<16x128xf32>
    %11 = arith.mulf %3, %10 : vector<16x128xf32>
    %12 = arith.truncf %11 : vector<16x128xf32> to vector<16x128xbf16>
    %c0_4 = arith.constant 0 : index
    %c0_5 = arith.constant 0 : index
    %13 = vector.load %arg4[%c0_4, %c0_5] : memref<128x128xbf16, #tpu.memory_space<vmem>>, vector<128x128xbf16>
    %cst_6 = arith.constant dense<0.000000e+00> : vector<16x128xf32>
    %14 = tpu.matmul %12, %13, %cst_6 {dimension_numbers = #tpu.dot_dimension_numbers<[1], [0], [0], [1], [0, 0, 1, 1], [], []>} : vector<16x128xbf16>, vector<128x128xbf16>, vector<16x128xf32> -> vector<16x128xf32>
    %c0_i32 = arith.constant 0 : i32
    %15 = arith.cmpi eq, %arg1, %c0_i32 : i32
    %16 = arith.extui %15 : i1 to i32
    %c0_i32_7 = arith.constant 0 : i32
    %17 = arith.cmpi ne, %16, %c0_i32_7 : i32
    scf.if %17 {
      %c0_10 = arith.constant 0 : index
      %c0_11 = arith.constant 0 : index
      %21 = vector.load %arg5[%c0_10, %c0_11] : memref<16x128xf32, #tpu.memory_space<vmem>>, vector<16x128xf32>
      tpu.vector_store %arg5[%c0_10, %c0_11], %14 {strides = array<i32>} : memref<16x128xf32, #tpu.memory_space<vmem>>, vector<16x128xf32>,
    } else {
    }
    %c0_i32_8 = arith.constant 0 : i32
    %18 = arith.cmpi ne, %arg1, %c0_i32_8 : i32
    %19 = arith.extui %18 : i1 to i32
    %c0_i32_9 = arith.constant 0 : i32
    %20 = arith.cmpi ne, %19, %c0_i32_9 : i32
    scf.if %20 {
      %c0_10 = arith.constant 0 : index
      %c0_11 = arith.constant 0 : index
      %21 = vector.load %arg5[%c0_10, %c0_11] : memref<16x128xf32, #tpu.memory_space<vmem>>, vector<16x128xf32>
      %22 = arith.addf %21, %14 : vector<16x128xf32>
      %c0_12 = arith.constant 0 : index
      %c0_13 = arith.constant 0 : index
      %23 = vector.load %arg5[%c0_12, %c0_13] : memref<16x128xf32, #tpu.memory_space<vmem>>, vector<16x128xf32>
      tpu.vector_store %arg5[%c0_12, %c0_13], %22 {strides = array<i32>} : memref<16x128xf32, #tpu.memory_space<vmem>>, vector<16x128xf32>,
    } else {
    }
    return
  }
  func.func @transform_0(%arg0: i32, %arg1: i32) -> (i32, i32) {
    %c0_i32 = arith.constant 0 : i32
    %c0_i32_0 = arith.constant 0 : i32
    return %arg0, %c0_i32 : i32, i32
  }
  func.func @transform_1(%arg0: i32, %arg1: i32) -> (i32, i32) {
    %c0_i32 = arith.constant 0 : i32
    %c0_i32_0 = arith.constant 0 : i32
    return %c0_i32, %arg1 : i32, i32
  }
  func.func @transform_2(%arg0: i32, %arg1: i32) -> (i32, i32) {
    %c0_i32 = arith.constant 0 : i32
    %c0_i32_0 = arith.constant 0 : i32
    return %arg1, %c0_i32 : i32, i32
  }
  func.func @transform_3(%arg0: i32, %arg1: i32) -> (i32, i32) {
    %c0_i32 = arith.constant 0 : i32
    %c0_i32_0 = arith.constant 0 : i32
    return %arg0, %c0_i32 : i32, i32
  }
}

</mosaic_0001>

<bundles_post_ra>
// kernel: tpu_custom_call.1
= control target key start
LH: loop header
LB: loop body
LE: loop exit
PB: predicated region body
PF: predicated region fallthrough
CT: control target
= control target key end

     0   :  { %8 = vsyncpa [#allocation3], 0  ;;  %s647_s0 = inlined_call_operand.hbm [shape: bf16[16,128], index: 0, kind: input, shape index: {}]   ;;  %s648_s1 = inlined_call_operand.hbm [shape: bf16[128,256], index: 1, kind: input, shape index: {}]   ;;  %s649_s2 = inlined_call_operand.hbm [shape: bf16[128,128], index: 2, kind: input, shape index: {}]   ;;  %s650_s3 = inlined_call_operand.hbm [shape: f32[16,128], index: 3, kind: output, shape index: {}]  }
   0x1   :  { %9 = vsyncpa [#allocation6], 0 }
   0x2   :  { %10 = vsyncpa [#allocation4], 0  ;;  %s562_s12 = smov [#allocation5]   ;;  %s468_s16 = scalar_lea.hbm %s648_s1, 2048 }
   0x3   :  { %s28_s13 = sshll.u32 %s562_s12, 4  ;;  %p469_p0 = scmp.ne.s32.totalorder %s648_s1, %s468_s16  ;;  %s29_s13 = int_to_ptr.vmem [resolvable:$true] %s28_s13 }
   0x4   :  { %p472_p1 = scmp.lt.u32.totalorder %s468_s16, %s648_s1 }
   0x6   :  { %p474_p2 = pnand %p472_p1, %p469_p0 }
   0x8   :  { %477 = shalt.err (!%p474_p2)
}
   0x9   :  { %s478_s21 = scalar_lea.vmem %s29_s13, 2048  ;;  %p483_p4 = scmp.lt.s32.totalorder %s29_s13, %s29_s13 }
   0xa   :  { %p479_p3 = scmp.ne.s32.totalorder %s29_s13, %s478_s21  ;;  %p484_p5 = scmp.lt.s32.totalorder %s478_s21, %s478_s21 }
   0xc   :  { %p485_p6 = por %p484_p5, %p483_p4 }
   0xe   :  { %p486_p7 = pnand %p485_p6, %p479_p3 }
  0x10   :  { %489 = shalt.err (!%p486_p7)
}
  0x11   :  { %s563_s22 = smov 128   ;;  %s564_s23 = smov 8  }
  0x12   :  { %34 = dma.hbm_to_vmem [thread:$0]  %s648_s1, 2048, %s29_s13, [#allocation6], %s563_s22, %s563_s22, %s564_s23  }
  0x13   :  { %s565_s26 = smov [#allocation2]   ;;  %s490_s30 = scalar_lea.hbm %s647_s0, 128 }
  0x14   :  { %s16_s27 = sshll.u32 %s565_s26, 4  ;;  %p491_p8 = scmp.ne.s32.totalorder %s647_s0, %s490_s30  ;;  %s17_s27 = int_to_ptr.vmem [resolvable:$true] %s16_s27 }
  0x15   :  { %p494_p9 = scmp.lt.u32.totalorder %s490_s30, %s647_s0 }
  0x17   :  { %p496_p10 = pnand %p494_p9, %p491_p8 }
  0x19   :  { %499 = shalt.err (!%p496_p10)
}
  0x1a   :  { %s500_s8 = scalar_lea.vmem %s17_s27, 128  ;;  %p505_p12 = scmp.lt.s32.totalorder %s17_s27, %s17_s27 }
  0x1b   :  { %p501_p11 = scmp.ne.s32.totalorder %s17_s27, %s500_s8  ;;  %p506_p13 = scmp.lt.s32.totalorder %s500_s8, %s500_s8 }
  0x1d   :  { %p507_p0 = por %p506_p13, %p505_p12 }
  0x1f   :  { %p508_p1 = pnand %p507_p0, %p501_p11 }
  0x21   :  { %511 = shalt.err (!%p508_p1)
}
  0x22   :  { %s566_s1 = smov 64   ;;  %s567_s9 = smov 4  }
  0x23   :  { %22 = dma.hbm_to_vmem [thread:$0]  %s647_s0, 128, %s17_s27, [#allocation3], %s566_s1, %s566_s1, %s567_s9  }
  0x24   :  { %s568_s12 = smov [#allocation7]   ;;  %s512_s16 = scalar_lea.hbm %s649_s2, 1024 }
  0x25   :  { %s40_s13 = sshll.u32 %s568_s12, 4  ;;  %p513_p2 = scmp.ne.s32.totalorder %s649_s2, %s512_s16  ;;  %s41_s13 = int_to_ptr.vmem [resolvable:$true] %s40_s13 }
  0x26   :  { %p516_p3 = scmp.lt.u32.totalorder %s512_s16, %s649_s2 }
  0x28   :  { %p518_p4 = pnand %p516_p3, %p513_p2 }
  0x2a   :  { %521 = shalt.err (!%p518_p4)
}
  0x2b   :  { %s522_s21 = scalar_lea.vmem %s41_s13, 1024  ;;  %p527_p6 = scmp.lt.s32.totalorder %s41_s13, %s41_s13 }
  0x2c   :  { %p523_p5 = scmp.ne.s32.totalorder %s41_s13, %s522_s21  ;;  %p528_p7 = scmp.lt.s32.totalorder %s522_s21, %s522_s21 }
  0x2e   :  { %p529_p8 = por %p528_p7, %p527_p6 }
  0x30   :  { %p530_p9 = pnand %p529_p8, %p523_p5 }
  0x32   :  { %533 = shalt.err (!%p530_p9)
}
  0x33   :  { %46 = dma.hbm_to_vmem [thread:$0]  %s649_s2, 1024, %s41_s13, [#allocation6], %s566_s1, %s566_s1, %s567_s9  }
  0x34   :  { %556 = dma.done.wait [#allocation3], 128  }
  0x35   :  { %557 = vsyncadd [#allocation3], 4294967168 }
  0x36   :  { %558 = dma.done.wait [#allocation6], 3072  }
  0x37   :  { %559 = vsyncadd [#allocation6], 4294964224  ;;  %v569_v0 = vmov 0   ;;  %v427_v1 = vld [vmem:[#allocation5 + $0x4] ss:$8 sps:$4 sm:$0xff]   ;;  %v451_v17 = vld [vmem:[#allocation2] sm:$0xff]  }
  0x38   :  { %193 = vmatprep.mubr.bf16.mxu0 %v569_v0  ;;  %v429_v2 = vld [vmem:[#allocation5] ss:$8 sps:$4 sm:$0xff]   ;;  %161 = vmatprep.subr.bf16.mxu0 %v427_v1  ;;  %v430_v3 = vld [vmem:[#allocation5 + $0x14] ss:$8 sps:$4 sm:$0xff]   ;;  %v432_v4 = vld [vmem:[#allocation5 + $0x10] ss:$8 sps:$4 sm:$0xff]  }
  0x39   :  { %162 = vmatpush1.bf16.msra.mxu0 %v429_v2  ;;  %v433_v5 = vld [vmem:[#allocation5 + $0x24] ss:$8 sps:$4 sm:$0xff]   ;;  %v435_v6 = vld [vmem:[#allocation5 + $0x20] ss:$8 sps:$4 sm:$0xff]   ;;  %v436_v7 = vld [vmem:[#allocation5 + $0x34] ss:$8 sps:$4 sm:$0xff]  }
  0x3a   :  { %163 = vmatprep.subr.bf16.mxu0 %v430_v3  ;;  %v438_v8 = vld [vmem:[#allocation5 + $0x30] ss:$8 sps:$4 sm:$0xff]   ;;  %v439_v9 = vld [vmem:[#allocation5 + $0x44] ss:$8 sps:$4 sm:$0xff]   ;;  %v441_v10 = vld [vmem:[#allocation5 + $0x40] ss:$8 sps:$4 sm:$0xff]  }
  0x3b   :  { %v442_v11 = vld [vmem:[#allocation5 + $0x54] ss:$8 sps:$4 sm:$0xff]   ;;  %v444_v12 = vld [vmem:[#allocation5 + $0x50] ss:$8 sps:$4 sm:$0xff]   ;;  %v445_v13 = vld [vmem:[#allocation5 + $0x64] ss:$8 sps:$4 sm:$0xff]  }
  0x3c   :  { %v447_v14 = vld [vmem:[#allocation5 + $0x60] ss:$8 sps:$4 sm:$0xff]   ;;  %v448_v15 = vld [vmem:[#allocation5 + $0x74] ss:$8 sps:$4 sm:$0xff]   ;;  %v450_v16 = vld [vmem:[#allocation5 + $0x70] ss:$8 sps:$4 sm:$0xff]  }
  0x3d   :  { %164 = vmatpush1.bf16.msra.mxu0 %v432_v4  ;;  %v452_v18 = vld [vmem:[#allocation7] sm:$0xff]   ;;  %v570_v19 = vmov 0.0   ;;  %v453_v20 = vld [vmem:[#allocation7 + $0x8] sm:$0xff]   ;;  %v454_v21 = vld [vmem:[#allocation7 + $0x10] sm:$0xff]   ;;  %vm571_vm0 = vmmov 0   ;;  %s572_s2 = smov [#allocation8]  }
  0x3e   :  { %165 = vmatprep.subr.bf16.mxu0 %v433_v5  ;;  %396 = vmatprep.subr.bf16.mxu1 %v570_v19  ;;  %v455_v22 = vld [vmem:[#allocation7 + $0x18] sm:$0xff]   ;;  %v456_v23 = vld [vmem:[#allocation7 + $0x20] sm:$0xff]   ;;  %v457_v24 = vld [vmem:[#allocation7 + $0x28] sm:$0xff]   ;;  %s347_s25 = sshll.u32 %s572_s2, 4  ;;  %s348_s25 = int_to_ptr.vmem [resolvable:$true] %s347_s25 }
  0x3f   :  { %397 = vmatpush3.bf16.msra.mxu1 %v452_v18  ;;  %v458_v25 = vld [vmem:[#allocation7 + $0x30] sm:$0xff]   ;;  %v459_v26 = vld [vmem:[#allocation7 + $0x38] sm:$0xff]   ;;  %412 = vmatprep.mubr.msk.bf16.mxu1 %vm571_vm0, %v570_v19  ;;  %s534_s26 = scalar_lea.vmem %s348_s25, 256  ;;  %p539_p11 = scmp.lt.s32.totalorder %s348_s25, %s348_s25 }
  0x40   :  { %398 = vmatprep.subr.bf16.mxu1 %v570_v19  ;;  %p535_p10 = scmp.ne.s32.totalorder %s348_s25, %s534_s26  ;;  %p540_p12 = scmp.lt.s32.totalorder %s534_s26, %s534_s26 }
  0x41   :  { %166 = vmatpush1.bf16.msra.mxu0 %v435_v6 }
  0x42   :  { %167 = vmatprep.subr.bf16.mxu0 %v436_v7  ;;  %p541_p13 = por %p540_p12, %p539_p11 }
  0x43   :  { %399 = vmatpush3.bf16.msra.mxu1 %v453_v20 }
  0x44   :  { %400 = vmatprep.subr.bf16.mxu1 %v570_v19  ;;  %p542_p0 = pnand %p541_p13, %p535_p10 }
  0x45   :  { %168 = vmatpush1.bf16.msra.mxu0 %v438_v8 }
  0x46   :  { %169 = vmatprep.subr.bf16.mxu0 %v439_v9 }
  0x47   :  { %401 = vmatpush3.bf16.msra.mxu1 %v454_v21 }
  0x48   :  { %402 = vmatprep.subr.bf16.mxu1 %v570_v19 }
  0x49   :  { %170 = vmatpush1.bf16.msra.mxu0 %v441_v10 }
  0x4a   :  { %171 = vmatprep.subr.bf16.mxu0 %v442_v11 }
  0x4b   :  { %403 = vmatpush3.bf16.msra.mxu1 %v455_v22 }
  0x4c   :  { %404 = vmatprep.subr.bf16.mxu1 %v570_v19 }
  0x4d   :  { %172 = vmatpush1.bf16.msra.mxu0 %v444_v12 }
  0x4e   :  { %173 = vmatprep.subr.bf16.mxu0 %v445_v13 }
  0x4f   :  { %405 = vmatpush3.bf16.msra.mxu1 %v456_v23 }
  0x50   :  { %406 = vmatprep.subr.bf16.mxu1 %v570_v19 }
  0x51   :  { %174 = vmatpush1.bf16.msra.mxu0 %v447_v14 }
  0x52   :  { %175 = vmatprep.subr.bf16.mxu0 %v448_v15 }
  0x53   :  { %407 = vmatpush3.bf16.msra.mxu1 %v457_v24 }
  0x54   :  { %408 = vmatprep.subr.bf16.mxu1 %v570_v19 }
  0x55   :  { %176 = vmatpush1.bf16.msra.mxu0 %v450_v16 }
  0x57   :  { %409 = vmatpush3.bf16.msra.mxu1 %v458_v25 }
  0x58   :  { %194 = vmatmul.mubr.bf16.vlgmr.msra.gmra.mrb[0].mxu0 %v451_v17  ;;  %410 = vmatprep.subr.bf16.mxu1 %v570_v19 }
  0x5b   :  { %411 = vmatpush3.bf16.msra.mxu1 %v459_v26 }
 0x12b   :  { %v195_v27 = vpop.f32.mrb[0].mxu0 }
 0x12c   :  { %v197_v28 = vpop.f32.mrb[1].mxu0 }
 0x12d   :  { %v377_v29 = vmul.f32 -1.442695, %v197_v28  ;;  %v199_v30 = vpop.f32.mrb[2].mxu0 }
 0x12e   :  { %v201_v31 = vpop.f32.mrb[3].mxu0 }
 0x12f   :  { %460 = vpow2.f32 %v377_v29  ;;  %v378_v32 = vmul.f32 -1.442695, %v201_v31 }
 0x131   :  { %462 = vpow2.f32 %v378_v32 }
 0x139   :  { %v461_v33 = vpop.eup %460 }
 0x13a   :  { %v210_v34 = vadd.f32 1.0, %v461_v33 }
 0x13b   :  { %v463_v35 = vpop.eup %462 }
 0x13c   :  { %464 = vrcp.f32 %v210_v34  ;;  %v211_v36 = vadd.f32 1.0, %v463_v35 }
 0x13e   :  { %466 = vrcp.f32 %v211_v36 }
 0x146   :  { %v465_v37 = vpop.eup %464 }
 0x147   :  { %v216_v38 = vmul.f32 %v465_v37, %v197_v28 }
 0x148   :  { %v467_v39 = vpop.eup %466 }
 0x149   :  { %v218_v40 = vmul.f32 %v216_v38, %v195_v27  ;;  %v217_v41 = vmul.f32 %v467_v39, %v201_v31 }
 0x14b   :  { %v219_v42 = vmul.f32 %v217_v41, %v199_v30 }
 0x14d   :  { %v220_v43 = vpack.c.bf16 %v219_v42, %v218_v40 }
 0x14f   :  { %413 = vmatmul.mubr.bf16.vlgmr.msra.gmra.mrb[0].mxu1 %v220_v43 }
 0x222   :  { %v319_v44 = vpop.f32.mrb[0].mxu1 }
 0x223   :  { %330 = vst [vmem:[#allocation8] sm:$0xff] %v319_v44  ;;  %v414_v45 = vpop.f32.mrb[1].mxu1 }
 0x224   :  { %v322_v46 = vpop.f32.mrb[2].mxu1 }
 0x225   :  { %331 = vst [vmem:[#allocation8 + $0x8] sm:$0xff] %v322_v46  ;;  %v415_v47 = vpop.f32.mrb[3].mxu1 }
 0x226   :  { %545 = shalt.err (!%p542_p0)
}
 0x227   :  { %s546_s29 = scalar_lea.hbm %s650_s3, 256 }
 0x228   :  { %p547_p1 = scmp.ne.s32.totalorder %s650_s3, %s546_s29  ;;  %p550_p2 = scmp.lt.u32.totalorder %s546_s29, %s650_s3 }
 0x22a   :  { %p552_p3 = pnand %p550_p2, %p547_p1 }
 0x22c   :  { %555 = shalt.err (!%p552_p3)
}
 0x22d   :  { %353 = dma.vmem_to_hbm [thread:$0]  %s348_s25, 256, %s650_s3, [#allocation4], %s563_s22, %s563_s22, %s564_s23  }
 0x22e   :  { %560 = dma.done.wait [#allocation4], 256  }
 0x22f   :  { %561 = vsyncadd [#allocation4], 4294967040 }
 0x230   :  { %357 = vsyncpa [#allocation3], 1 }
 0x231   :  { %358 = vsyncpa [#allocation6], 1 }
 0x232   :  { %359 = vsyncpa [#allocation4], 1 }

</bundles_post_ra>
